<compile_context>
chip_gen: v5e
topology: v5e:2x2
jax: 0.10.0
libtpu: 0.0.40
codegen_flags: <defaults>
</compile_context>

<pallas_src>
import jax
import jax.numpy as jnp
from jax.experimental import pallas as pl
from jax.experimental.pallas import tpu as pltpu


def _chomp_kernel(x_ref, o_ref):
    # Identical (TR, TL) blocks for input and output: straight VMEM copy.
    o_ref[...] = x_ref[...]


def _round_up(x: int, m: int) -> int:
    return ((x + m - 1) // m) * m


def _sublane_quantum(dtype) -> int:
    # 8 sublanes of 32-bit; sub-32-bit dtypes pack along sublanes.
    itemsize = jnp.dtype(dtype).itemsize
    return max(8, 32 // max(itemsize, 1))  # f32 -> 8, bf16 -> 16, int8 -> 32


def chomp1d(x: jax.Array, chomp_size: int,
            *, row_tile: int = 512, lane_tile: int = 1024) -> jax.Array:
    """Equivalent of Chomp1d(chomp_size).forward(x) for x of shape (N, C, L).

    Note: chomp_size == 0 is rejected (PyTorch's x[:, :, :-0] yields an empty
    tensor, which is almost certainly unintended in the TCN use-case).
    """
    assert x.ndim == 3, "expected (N, C, L) input"
    n, c, l = x.shape
    assert 0 < chomp_size < l, "chomp_size must be in (0, L)"
    l_out = l - chomp_size

    rows = n * c
    x2 = x.reshape(rows, l)  # free: only the last dim is sliced

    itemsize = jnp.dtype(x.dtype).itemsize
    sub = _sublane_quantum(x.dtype)

    # Lane-dense, sublane-aligned tiles; never larger than the (padded) array.
    tr = min(row_tile, _round_up(rows, sub))
    tl = min(lane_tile, _round_up(l_out, 128))
    grid = (pl.cdiv(rows, tr), pl.cdiv(l_out, tl))

    out2 = pl.pallas_call(
        _chomp_kernel,
        out_shape=jax.ShapeDtypeStruct((rows, l_out), x.dtype),
        grid_spec=pltpu.PrefetchScalarGridSpec(
            num_scalar_prefetch=0,
            grid=grid,
            in_specs=[pl.BlockSpec((tr, tl), lambda r, t: (r, t))],
            out_specs=pl.BlockSpec((tr, tl), lambda r, t: (r, t)),
        ),
        compiler_params=pltpu.CompilerParams(
            dimension_semantics=("parallel", "parallel"),
        ),
        cost_estimate=pl.CostEstimate(
            flops=0,
            transcendentals=0,
            bytes_accessed=2 * rows * l_out * itemsize,
        ),
    )(x2)

    return out2.reshape(n, c, l_out)


if __name__ == "__main__":
    key = jax.random.PRNGKey(0)

    # Primary small case matching the module's typical NCL layout.
    N, C, L = 2, 4, 16
    chomp_size = 3
    x = jax.random.normal(key, (N, C, L), dtype=jnp.float32)

    out = jax.block_until_ready(chomp1d(x, chomp_size))
    ref = x[:, :, :-chomp_size]
    assert out.shape == (N, C, L - chomp_size), out.shape
    assert out.dtype == x.dtype
    assert jnp.array_equal(out, ref), "mismatch vs reference slice"

    # Secondary case exercising multiple lane tiles and a partial tail tile.
    key2 = jax.random.PRNGKey(1)
    x2 = jax.random.normal(key2, (1, 8, 1300), dtype=jnp.float32)
    out2 = jax.block_until_ready(chomp1d(x2, 11))
    assert jnp.array_equal(out2, x2[:, :, :-11]), "mismatch on tiled case"

    print("KERNEL_OK")
</pallas_src>

<mosaic_0001>
module attributes {stable_mosaic.version = 11 : i64} {
  func.func @_chomp_kernel(%arg0: i32, %arg1: i32, %arg2: memref<8x128xf32, #tpu.memory_space<vmem>>, %arg3: memref<8x128xf32, #tpu.memory_space<vmem>>) attributes {dimension_semantics = [#tpu.dimension_semantics<parallel>, #tpu.dimension_semantics<parallel>], iteration_bounds = array<i64: 1, 1>, scalar_prefetch = 0 : i64, scratch_operands = 0 : i64, tpu.core_type = #tpu.core_type<tc>, window_params = [{transform_indices = @transform_0, window_bounds = array<i64: 8, 128>}, {transform_indices = @transform_1, window_bounds = array<i64: 8, 128>}]} {
    %c0 = arith.constant 0 : index
    %c0_0 = arith.constant 0 : index
    %0 = vector.load %arg2[%c0, %c0_0] : memref<8x128xf32, #tpu.memory_space<vmem>>, vector<8x128xf32>
    %c0_1 = arith.constant 0 : index
    %c0_2 = arith.constant 0 : index
    %1 = vector.load %arg3[%c0_1, %c0_2] : memref<8x128xf32, #tpu.memory_space<vmem>>, vector<8x128xf32>
    tpu.vector_store %arg3[%c0_1, %c0_2], %0 {strides = array<i32>} : memref<8x128xf32, #tpu.memory_space<vmem>>, vector<8x128xf32>,
    return
  }
  func.func @transform_0(%arg0: i32, %arg1: i32) -> (i32, i32) {
    %c0_i32 = arith.constant 0 : i32
    return %arg0, %arg1 : i32, i32
  }
  func.func @transform_1(%arg0: i32, %arg1: i32) -> (i32, i32) {
    %c0_i32 = arith.constant 0 : i32
    return %arg0, %arg1 : i32, i32
  }
}

</mosaic_0001>

<bundles_post_ra>
// kernel: tpu_custom_call.1
= control target key start
LH: loop header
LB: loop body
LE: loop exit
PB: predicated region body
PF: predicated region fallthrough
CT: control target
= control target key end

     0   :  { %6 = vsyncpa [#allocation3], 0  ;;  %s114_s0 = inlined_call_operand.hbm [shape: f32[8,16], index: 0, kind: input, shape index: {}]   ;;  %s115_s1 = inlined_call_operand.hbm [shape: f32[8,13], index: 1, kind: output, shape index: {}]  }
   0x1   :  { %7 = vsyncpa [#allocation4], 0  ;;  %s13_s8 = sshll.u32 %s114_s0, 4  ;;  %s96_s9 = smov [#allocation2]   ;;  %s14_s8 = int_to_ptr.hbm [resolvable:$true] %s13_s8 }
   0x2   :  { %s15_s10 = sshll.u32 %s96_s9, 4  ;;  %s16_s10 = int_to_ptr.vmem [resolvable:$true] %s15_s10 }
   0x3   :  { %18 = dma.hbm_to_vmem [thread:$0]  %s14_s8, 128, %s16_s10, [#allocation3]  }
   0x4   :  { %92 = dma.done.wait [#allocation3], 128  }
   0x5   :  { %93 = vsyncadd [#allocation3], 4294967168  ;;  %s97_s11 = smov [#allocation5]   ;;  %s32_s15 = sshll.u32 %s115_s1, 4  ;;  %v23_v0 = vld [vmem:[#allocation2] sm:$0xff]  ;;  %s33_s15 = int_to_ptr.hbm [resolvable:$true] %s32_s15 }
   0x6   :  { %s30_s12 = sshll.u32 %s97_s11, 4  ;;  %24 = vst [vmem:[#allocation5] sm:$0xff] %v23_v0  ;;  %s31_s12 = int_to_ptr.vmem [resolvable:$true] %s30_s12 }
   0x7   :  { %35 = dma.vmem_to_hbm [thread:$0]  %s31_s12, 128, %s33_s15, [#allocation4]  }
   0x8   :  { %94 = dma.done.wait [#allocation4], 128  }
   0x9   :  { %95 = vsyncadd [#allocation4], 4294967168 }
   0xa   :  { %40 = vsyncpa [#allocation3], 1 }
   0xb   :  { %41 = vsyncpa [#allocation4], 1 }

</bundles_post_ra>
